<compile_context>
chip_gen: v5e
topology: v5e:2x2
jax: 0.10.0
libtpu: 0.0.40
codegen_flags: <defaults>
</compile_context>

<pallas_src>
import jax
import jax.numpy as jnp
from jax import lax
from jax.experimental import pallas as pl
from jax.experimental.pallas import tpu as pltpu

IN_FEATURES = 784
OUT_FEATURES = 10
_LANE = 128
_SUBLANE = 8


def _linear_kernel(x_ref, w_ref, b_ref, o_ref):
    """o = x @ W^T + b for one batch tile.

    x_ref: (TM, 784) f32   -- batch tile (pipelined HBM read; the bottleneck)
    w_ref: (10, 784)  f32  -- resident across grid steps
    b_ref: (1, 10)    f32
    o_ref: (TM, 10)   f32
    """
    acc = lax.dot_general(
        x_ref[...], w_ref[...],
        dimension_numbers=(((1,), (1,)), ((), ())),   # contract 784 on both
        preferred_element_type=jnp.float32,           # f32 accumulation
    )                                                 # -> (TM, 10)
    o_ref[...] = acc + b_ref[...]


def _pick_tile(b, tm):
    """Batch tile size: full block for tiny B, else >=2 tiles (v7x megacore)."""
    if b <= 256:
        return b                                      # single full-extent block
    half = _SUBLANE * pl.cdiv(pl.cdiv(b, 2), _SUBLANE)
    tm_eff = min(tm, half)
    return max(_SUBLANE, (tm_eff // _SUBLANE) * _SUBLANE)


def _vmem_limit_bytes(tm_eff):
    """Scoped-VMEM budget, accounting for lane padding (784->896, 10->128)
    and double-buffered pipelining of every BlockSpec operand."""
    x_blk = tm_eff * 896 * 4
    o_blk = tm_eff * _LANE * 4
    w_blk = 16 * 896 * 4
    b_blk = _SUBLANE * _LANE * 4
    need = 2 * (x_blk + o_blk + w_blk + b_blk)
    return int(min(max(need + (8 << 20), 16 << 20), 48 << 20))


def transformer_1_forward(x, weight, bias, *, tm=2048):
    """Replicates Transformer_1.forward.

    x:      (B, 1, 28, 28) float32 (NCHW, like PyTorch)
    weight: (10, 784) float32      (PyTorch nn.Linear layout: out x in)
    bias:   (10,) float32
    returns (y, y) with y of shape (B, 10)
    """
    x2d = x.reshape(-1, IN_FEATURES)                  # x.view(-1, 784)
    b = x2d.shape[0]

    w = weight.astype(jnp.float32)                    # (10, 784), stays resident
    b2d = bias.reshape(1, OUT_FEATURES).astype(jnp.float32)

    tm_eff = _pick_tile(b, tm)
    grid_b = pl.cdiv(b, tm_eff)                       # ragged last block OK

    cost = pl.CostEstimate(
        flops=2 * b * IN_FEATURES * OUT_FEATURES,
        transcendentals=0,
        bytes_accessed=(b * IN_FEATURES * 4               # x (f32 read)
                        + OUT_FEATURES * IN_FEATURES * 4  # weight
                        + OUT_FEATURES * 4                # bias
                        + b * OUT_FEATURES * 4),          # y (f32 write)
    )

    y = pl.pallas_call(
        _linear_kernel,
        out_shape=jax.ShapeDtypeStruct((b, OUT_FEATURES), jnp.float32),
        grid=(grid_b,),
        in_specs=[
            pl.BlockSpec((tm_eff, IN_FEATURES), lambda i: (i, 0)),      # x tile
            pl.BlockSpec((OUT_FEATURES, IN_FEATURES), lambda i: (0, 0)),
            pl.BlockSpec((1, OUT_FEATURES), lambda i: (0, 0)),
        ],
        out_specs=pl.BlockSpec((tm_eff, OUT_FEATURES), lambda i: (i, 0)),
        compiler_params=pltpu.CompilerParams(
            dimension_semantics=("parallel",),        # megacore on v7x
            vmem_limit_bytes=_vmem_limit_bytes(tm_eff),
        ),
        cost_estimate=cost,
    )(x2d, w, b2d)

    return (y, y)


def _reference(x, weight, bias):
    return x.reshape(-1, IN_FEATURES) @ weight.T + bias


if __name__ == "__main__":
    key = jax.random.PRNGKey(0)
    k_x, k_w, k_b, k_x2 = jax.random.split(key, 4)

    # PyTorch-default-like init for nn.Linear(784, 10).
    bound = 1.0 / jnp.sqrt(float(IN_FEATURES))
    weight = jax.random.uniform(k_w, (OUT_FEATURES, IN_FEATURES),
                                dtype=jnp.float32, minval=-bound, maxval=bound)
    bias = jax.random.uniform(k_b, (OUT_FEATURES,), dtype=jnp.float32,
                              minval=-bound, maxval=bound)

    # --- Small-batch check (single full block), input_size = (1, 28, 28) ---
    batch = 2
    x = jax.random.normal(k_x, (batch, 1, 28, 28), dtype=jnp.float32)
    y1, y2 = transformer_1_forward(x, weight, bias)
    jax.block_until_ready((y1, y2))

    ref = _reference(x, weight, bias)
    assert y1.shape == (batch, OUT_FEATURES) and y2.shape == (batch, OUT_FEATURES)
    assert jnp.allclose(y1, ref, atol=1e-2, rtol=1e-2)
    assert jnp.allclose(y2, ref, atol=1e-2, rtol=1e-2)

    # --- Tiled + ragged-last-block path (B not a multiple of TM, no pad) ---
    batch2, tm_small = 520, 256
    x2 = jax.random.normal(k_x2, (batch2, 1, 28, 28), dtype=jnp.float32)
    z1, _ = transformer_1_forward(x2, weight, bias, tm=tm_small)
    jax.block_until_ready(z1)
    ref2 = _reference(x2, weight, bias)
    assert z1.shape == (batch2, OUT_FEATURES)
    assert jnp.allclose(z1, ref2, atol=1e-2, rtol=1e-2)

    print("KERNEL_OK")
</pallas_src>

<mosaic_0001>
module attributes {stable_mosaic.version = 11 : i64} {
  func.func @_linear_kernel(%arg0: i32, %arg1: memref<2x784xf32, #tpu.memory_space<vmem>>, %arg2: memref<10x784xf32, #tpu.memory_space<vmem>>, %arg3: memref<1x10xf32, #tpu.memory_space<vmem>>, %arg4: memref<2x10xf32, #tpu.memory_space<vmem>>) attributes {dimension_semantics = [#tpu.dimension_semantics<parallel>], iteration_bounds = array<i64: 1>, scalar_prefetch = 0 : i64, scratch_operands = 0 : i64, tpu.core_type = #tpu.core_type<tc>, window_params = [{transform_indices = @transform_0, window_bounds = array<i64: 2, 784>}, {pipeline_mode = #tpu.pipeline_mode<synchronous>, transform_indices = @transform_1, window_bounds = array<i64: 10, 784>}, {pipeline_mode = #tpu.pipeline_mode<synchronous>, transform_indices = @transform_2, window_bounds = array<i64: 1, 10>}, {transform_indices = @transform_3, window_bounds = array<i64: 2, 10>}]} {
    %c0 = arith.constant 0 : index
    %c0_0 = arith.constant 0 : index
    %0 = vector.load %arg1[%c0, %c0_0] : memref<2x784xf32, #tpu.memory_space<vmem>>, vector<2x784xf32>
    %c0_1 = arith.constant 0 : index
    %c0_2 = arith.constant 0 : index
    %1 = vector.load %arg2[%c0_1, %c0_2] : memref<10x784xf32, #tpu.memory_space<vmem>>, vector<10x784xf32>
    %cst = arith.constant dense<0.000000e+00> : vector<2x10xf32>
    %2 = tpu.matmul %0, %1, %cst {dimension_numbers = #tpu.dot_dimension_numbers<[1], [1], [0], [0], [0, 0, 1, 0], [], []>} : vector<2x784xf32>, vector<10x784xf32>, vector<2x10xf32> -> vector<2x10xf32>
    %c0_3 = arith.constant 0 : index
    %c0_4 = arith.constant 0 : index
    %3 = vector.load %arg3[%c0_3, %c0_4] : memref<1x10xf32, #tpu.memory_space<vmem>>, vector<1x10xf32>
    %4 = vector.broadcast %3 : vector<1x10xf32> to vector<2x10xf32>
    %5 = arith.addf %2, %4 : vector<2x10xf32>
    %c0_5 = arith.constant 0 : index
    %c0_6 = arith.constant 0 : index
    %6 = vector.load %arg4[%c0_5, %c0_6] : memref<2x10xf32, #tpu.memory_space<vmem>>, vector<2x10xf32>
    tpu.vector_store %arg4[%c0_5, %c0_6], %5 {strides = array<i32>} : memref<2x10xf32, #tpu.memory_space<vmem>>, vector<2x10xf32>,
    return
  }
  func.func @transform_0(%arg0: i32) -> (i32, i32) {
    %c0_i32 = arith.constant 0 : i32
    %c0_i32_0 = arith.constant 0 : i32
    return %arg0, %c0_i32 : i32, i32
  }
  func.func @transform_1(%arg0: i32) -> (i32, i32) {
    %c0_i32 = arith.constant 0 : i32
    %c0_i32_0 = arith.constant 0 : i32
    %c0_i32_1 = arith.constant 0 : i32
    return %c0_i32, %c0_i32_0 : i32, i32
  }
  func.func @transform_2(%arg0: i32) -> (i32, i32) {
    %c0_i32 = arith.constant 0 : i32
    %c0_i32_0 = arith.constant 0 : i32
    %c0_i32_1 = arith.constant 0 : i32
    return %c0_i32, %c0_i32_0 : i32, i32
  }
  func.func @transform_3(%arg0: i32) -> (i32, i32) {
    %c0_i32 = arith.constant 0 : i32
    %c0_i32_0 = arith.constant 0 : i32
    return %arg0, %c0_i32 : i32, i32
  }
}

</mosaic_0001>

<bundles_post_ra>
// kernel: tpu_custom_call.1
= control target key start
LH: loop header
LB: loop body
LE: loop exit
PB: predicated region body
PF: predicated region fallthrough
CT: control target
= control target key end

     0   :  { %8 = vsyncpa [#allocation3], 0  ;;  %s379_s0 = inlined_call_operand.hbm [shape: f32[2,784], index: 0, kind: input, shape index: {}]   ;;  %s380_s1 = inlined_call_operand.hbm [shape: f32[10,784], index: 1, kind: input, shape index: {}]   ;;  %s381_s2 = inlined_call_operand.vmem [shape: f32[1,10], index: 2, kind: input, shape index: {}]   ;;  %s382_s3 = inlined_call_operand.hbm [shape: f32[2,10], index: 3, kind: output, shape index: {}]  }
   0x1   :  { %9 = vsyncpa [#allocation6], 0 }
   0x2   :  { %10 = vsyncpa [#allocation4], 0  ;;  %s16_s14 = sshll.u32 %s379_s0, 4  ;;  %s339_s15 = smov [#allocation2]   ;;  %s17_s14 = int_to_ptr.hbm [resolvable:$true] %s16_s14 }
   0x3   :  { %s18_s16 = sshll.u32 %s339_s15, 4  ;;  %s26_s19 = sshll.u32 %s380_s1, 4  ;;  %s19_s16 = int_to_ptr.vmem [resolvable:$true] %s18_s16  ;;  %s27_s19 = int_to_ptr.hbm [resolvable:$true] %s26_s19 }
   0x4   :  { %21 = dma.hbm_to_vmem [thread:$0]  %s17_s14, 224, %s19_s16, [#allocation3]  }
   0x5   :  { %s340_s20 = smov [#allocation5]   ;;  %s341_s22 = smov 896  }
   0x6   :  { %s28_s21 = sshll.u32 %s340_s20, 4  ;;  %s342_s23 = smov 56   ;;  %s29_s21 = int_to_ptr.vmem [resolvable:$true] %s28_s21 }
   0x7   :  { %34 = dma.hbm_to_vmem [thread:$0]  %s27_s19, 1792, %s29_s21, [#allocation6], %s341_s22, %s341_s22, %s342_s23  }
   0x8   :  { %333 = dma.done.wait [#allocation3], 224  }
   0x9   :  { %334 = vsyncadd [#allocation3], 4294967072 }
   0xa   :  { %335 = dma.done.wait [#allocation6], 1792  }
   0xb   :  { %336 = vsyncadd [#allocation6], 4294965504  ;;  %v56_v0 = vld [vmem:[#allocation5 + $0x48] sm:$0x3]  ;;  %v54_v1 = vld [vmem:[#allocation5 + $0x38] sm:$0x3] }
   0xc   :  { %v57_v2 = vld [vmem:[#allocation5 + $0x50] sm:$0x3]  ;;  %146 = vmatpush.xpose.msra.mxu2 %v56_v0  ;;  %106 = vmatpush.xpose.msra.mxu0 %v54_v1  ;;  %v55_v3 = vld [vmem:[#allocation5 + $0x40] sm:$0x3]  ;;  %v45_v6 = vld [vmem:[#allocation2] sm:$0xff]  ;;  %vm83_vm0 = vcmask 130048  }
   0xd   :  { %166 = vmatpush.xpose.msra.mxu3 %v57_v2  ;;  %126 = vmatpush.xpose.msra.mxu1 %v55_v3  ;;  %v49_v4 = vld [vmem:[#allocation5 + $0x10] sm:$0xff]  ;;  %v47_v5 = vld [vmem:[#allocation5] sm:$0xff]  ;;  %v50_v7 = vld [vmem:[#allocation5 + $0x18] sm:$0xff]  ;;  %67 = vst [vmem:[#allocation1] ss:$4 sm:$0xff] %v45_v6  ;;  %s343_s24 = smov [#allocation7]  }
   0xe   :  { %v60_v8 = vld [vmem:[#allocation5 + $0x68] sm:$0x3]  ;;  %v58_v10 = vld [vmem:[#allocation5 + $0x58] sm:$0x3]  ;;  %v59_v11 = vld [vmem:[#allocation5 + $0x60] sm:$0x3] }
   0xf   :  { %v48_v9 = vld [vmem:[#allocation5 + $0x8] sm:$0xff]  ;;  %v46_v12 = vld [vmem:[#allocation2 + $0x8] sm:$0x3f]  ;;  %v53_v13 = vld [vmem:[#allocation5 + $0x30] sm:$0xff]  ;;  %s239_s25 = sshll.u32 %s343_s24, 4  ;;  %s241_s28 = sshll.u32 %s382_s3, 4  ;;  %s240_s25 = int_to_ptr.vmem [resolvable:$true] %s239_s25  ;;  %s242_s28 = int_to_ptr.hbm [resolvable:$true] %s241_s28 }
  0x10   :  { %147 = vmatpush.xpose.msra.mxu2 %v49_v4  ;;  %107 = vmatpush.xpose.msra.mxu0 %v47_v5  ;;  %69 = vst [vmem:[#allocation1 + $0x20] ss:$4 sm:$0xff] %v46_v12  ;;  %v51_v14 = vld [vmem:[#allocation5 + $0x20] sm:$0xff]  ;;  %v52_v15 = vld [vmem:[#allocation5 + $0x28] sm:$0xff]  ;;  %vm232_vm1 = vcmask 74752  }
  0x11   :  { %167 = vmatpush.xpose.msra.mxu3 %v50_v7  ;;  %127 = vmatpush.xpose.msra.mxu1 %v48_v9  ;;  %v260_v23 = vld [vmem:[%s381_s2] ss:$0 sm:$0xff] }
  0x14   :  { %252 = vmatpush.xpose.msk.msrb.mxu2 %vm83_vm0, %v60_v8  ;;  %186 = vmatpush.xpose.msrb.mxu0 %v58_v10  ;;  %v72_v16 = vld.sshfl [vmem:[#allocation1 + $0x10] sm:$0xff pattern:$0x73625140]  ;;  %v70_v17 = vld.sshfl [vmem:[#allocation1] sm:$0xff pattern:$0x73625140] }
  0x15   :  { %206 = vmatpush.xpose.msrb.mxu1 %v59_v11  ;;  %148 = vmatmul.f32.vlgmr.msra.gmra.mxu2 %v72_v16  ;;  %v73_v18 = vld.sshfl [vmem:[#allocation1 + $0x18] sm:$0xff pattern:$0x73625140]  ;;  %v71_v19 = vld.sshfl [vmem:[#allocation1 + $0x8] sm:$0xff pattern:$0x73625140] }
  0x16   :  { %108 = vmatmul.f32.vlgmr.msra.gmra.mxu0 %v70_v17  ;;  %168 = vmatmul.f32.vlgmr.msra.gmra.mxu3 %v73_v18 }
  0x17   :  { %128 = vmatmul.f32.vlgmr.msra.gmra.mxu1 %v71_v19  ;;  %v76_v20 = vld.sshfl [vmem:[#allocation1 + $0x30] sm:$0xff pattern:$0x73625140]  ;;  %v74_v21 = vld.sshfl [vmem:[#allocation1 + $0x20] sm:$0xff pattern:$0x73625140] }
  0x18   :  { %253 = vmatpush.xpose.msk.msrb.mxu2 %vm83_vm0, %v53_v13  ;;  %187 = vmatpush.xpose.msrb.mxu0 %v51_v14  ;;  %v75_v22 = vld.sshfl [vmem:[#allocation1 + $0x28] sm:$0xff pattern:$0x73625140] }
  0x19   :  { %207 = vmatpush.xpose.msrb.mxu1 %v52_v15 }
  0x1d   :  { %254 = vmatmul.msk.f32.vlgmr.msrb.gmra.mxu2 %vm83_vm0, %v76_v20 }
  0x1e   :  { %188 = vmatmul.f32.vlgmr.msrb.gmra.mxu0 %v74_v21 }
  0x1f   :  { %208 = vmatmul.f32.vlgmr.msrb.gmra.mxu1 %v75_v22 }
  0x93   :  { %v109_v24 = vpop.f32.mrf.mxu0 }
  0x94   :  { %v110_v25 = vadd.f32 %v260_v23, %v109_v24  ;;  %v129_v26 = vpop.f32.mrf.mxu1 }
  0x96   :  { %v130_v27 = vadd.f32 %v129_v26, %v110_v25 }
  0x98   :  { %v149_v28 = vpop.f32.mrf.mxu2 }
  0x99   :  { %v150_v29 = vadd.f32 %v149_v28, %v130_v27  ;;  %v169_v30 = vpop.f32.mrf.mxu3 }
  0x9b   :  { %v189_v31 = vpop.f32.mrf.mxu0  ;;  %v170_v32 = vadd.f32 %v169_v30, %v150_v29 }
  0x9c   :  { %v209_v33 = vpop.f32.mrf.mxu1 }
  0x9d   :  { %v190_v34 = vadd.f32 %v189_v31, %v170_v32 }
  0x9f   :  { %v210_v35 = vadd.f32 %v209_v33, %v190_v34 }
  0xa0   :  { %v229_v36 = vpop.f32.mrf.mxu2 }
  0xa1   :  { %v230_v37 = vadd.f32 %v229_v36, %v210_v35 }
  0xa3   :  { %233 = vst.msk [vmem:[#allocation7] sm:$0x3] %vm232_vm1, %v230_v37 }
  0xa4   :  { %244 = dma.vmem_to_hbm [thread:$0]  %s240_s25, 32, %s242_s28, [#allocation4]  }
  0xa5   :  { %337 = dma.done.wait [#allocation4], 32  }
  0xa6   :  { %338 = vsyncadd [#allocation4], 4294967264 }
  0xa7   :  { %249 = vsyncpa [#allocation3], 1 }
  0xa8   :  { %250 = vsyncpa [#allocation6], 1 }
  0xa9   :  { %251 = vsyncpa [#allocation4], 1 }

</bundles_post_ra>
